<compile_context>
chip_gen: v6e
topology: v6e:2x2x1
jax: 0.10.0
libtpu: 0.0.40
codegen_flags: <defaults>
</compile_context>

<pallas_src>
import jax
import jax.numpy as jnp
from jax.experimental import pallas as pl
from jax.experimental.pallas import tpu as pltpu

LABEL_DIM = 32    # stands in for constants.label_dim
HIDDEN = 256
TM_MAX = 2048     # row-tile cap (VMEM-safe on all of v5e/v6e/v7x)


def _pick_tm(m, dtype):
    """Row tile: target >= 4 grid steps, cap at TM_MAX, keep a native sublane multiple."""
    sub = 16 if dtype == jnp.bfloat16 else 8     # native sublane tile for the x dtype
    tm = -(-m // 4)                              # ~4 blocks: 2 TCs (v7x) x double-buffering
    tm = sub * (-(-tm // sub))
    return int(max(sub, min(TM_MAX, tm)))


def _mlp_head_kernel(x_ref, w1_ref, b1_ref, w2_ref, b2_ref, o_ref):
    # x_ref : [TM, LABEL_DIM] f32 or bf16
    # w1_ref: [LABEL_DIM, HIDDEN] bf16
    # b1_ref: [1, HIDDEN] f32
    # w2_ref: [1, HIDDEN] f32    (second Linear as a row: VPU + XLU path)
    # b2_ref: [1] f32 in SMEM
    # o_ref : [TM, 1] f32
    x = x_ref[...]
    if x.dtype != jnp.bfloat16:          # static (trace-time) branch; no-op for bf16 input
        x = x.astype(jnp.bfloat16)

    # Linear(label_dim, 256) + ReLU : MXU (bf16 in, f32 accumulate) + VPU.
    h = jnp.dot(x, w1_ref[...], preferred_element_type=jnp.float32)
    h = jnp.maximum(h + b1_ref[...], 0.0)

    # Linear(256, 1) + Sigmoid : VPU multiply + XLU lane reduce + EUP sigmoid.
    y = jnp.sum(h * w2_ref[...], axis=-1, keepdims=True) + b2_ref[0]
    o_ref[...] = jax.nn.sigmoid(y).astype(o_ref.dtype)


def mlp_head(x2d, w1_bf16, b1_row, w2_row, b2_vec):
    """x2d: [M, LABEL_DIM] (f32 or bf16) -> [M, 1] f32."""
    m, d = x2d.shape
    assert d == LABEL_DIM
    tm = _pick_tm(m, x2d.dtype)
    grid = pl.cdiv(m, tm)    # ragged tail handled as a boundary block (no pad copy)

    return pl.pallas_call(
        _mlp_head_kernel,
        out_shape=jax.ShapeDtypeStruct((m, 1), jnp.float32),
        grid_spec=pltpu.PrefetchScalarGridSpec(
            num_scalar_prefetch=0,
            grid=(grid,),
            in_specs=[
                pl.BlockSpec((tm, LABEL_DIM), lambda i: (i, 0)),
                pl.BlockSpec((LABEL_DIM, HIDDEN), lambda i: (0, 0)),
                pl.BlockSpec((1, HIDDEN), lambda i: (0, 0)),
                pl.BlockSpec((1, HIDDEN), lambda i: (0, 0)),
                pl.BlockSpec(memory_space=pltpu.MemorySpace.SMEM),
            ],
            out_specs=pl.BlockSpec((tm, 1), lambda i: (i, 0)),
        ),
        compiler_params=pltpu.CompilerParams(
            dimension_semantics=("parallel",)),   # shards row blocks across the 2 TCs on v7x
    )(x2d, w1_bf16, b1_row, w2_row, b2_vec)


def prepare_params(params):
    """One-time conversion of the MLP-head params into kernel layout (hoisted out of forward)."""
    return {
        "w1_bf16": params["w1"].astype(jnp.bfloat16),                     # [32, 256]
        "b1_row": params["b1"].reshape(1, HIDDEN).astype(jnp.float32),    # [1, 256]
        "w2_row": params["w2"].reshape(1, HIDDEN).astype(jnp.float32),    # column -> row
        "b2": params["b2"].reshape(1).astype(jnp.float32),                # [1]  (SMEM)
    }


def fine_tuned_model_forward(transformer_output, prepared):
    """[B, S, LABEL_DIM] -> [B, S, 1] (matches the PyTorch MLP head)."""
    b, s, d = transformer_output.shape
    x2d = transformer_output.reshape(b * s, d)
    y = mlp_head(x2d, prepared["w1_bf16"], prepared["b1_row"],
                 prepared["w2_row"], prepared["b2"])
    return y.reshape(b, s, 1)


def init_params(key):
    k1, k2, k3, k4 = jax.random.split(key, 4)
    # Deterministic synthetic init (uniform like torch's Linear default range).
    lim1 = 1.0 / jnp.sqrt(LABEL_DIM)
    lim2 = 1.0 / jnp.sqrt(HIDDEN)
    return {
        "w1": jax.random.uniform(k1, (LABEL_DIM, HIDDEN), jnp.float32, -lim1, lim1),
        "b1": jax.random.uniform(k2, (1, HIDDEN), jnp.float32, -lim1, lim1),
        "w2": jax.random.uniform(k3, (HIDDEN, 1), jnp.float32, -lim2, lim2),
        "b2": jax.random.uniform(k4, (1, 1), jnp.float32, -lim2, lim2),
    }


def _ref_head(x2d_f32, params):
    """Pure-JAX f32 reference of the MLP head."""
    h = jnp.maximum(x2d_f32 @ params["w1"] + params["b1"], 0.0)
    return jax.nn.sigmoid(h @ params["w2"] + params["b2"])


if __name__ == "__main__":
    key = jax.random.PRNGKey(0)
    kp, kx1, kx2 = jax.random.split(key, 3)
    params = init_params(kp)
    prepared = prepare_params(params)   # one-time param layout conversion

    # Case 1: f32 activations, M = 16 rows (two 8-row tiles).
    B, S = 2, 8
    x1 = jax.random.normal(kx1, (B, S, LABEL_DIM), jnp.float32)
    out1 = jax.block_until_ready(fine_tuned_model_forward(x1, prepared))
    ref1 = _ref_head(x1.reshape(B * S, LABEL_DIM), params).reshape(B, S, 1)
    assert out1.shape == (B, S, 1)
    err1 = float(jnp.max(jnp.abs(out1 - ref1)))
    assert err1 < 1e-2, f"case1 max abs err {err1}"

    # Case 2: bf16 activations, ragged M = 21 (exercises the boundary block, no pad copy).
    B2, S2 = 3, 7
    x2 = jax.random.normal(kx2, (B2, S2, LABEL_DIM), jnp.float32).astype(jnp.bfloat16)
    out2 = jax.block_until_ready(fine_tuned_model_forward(x2, prepared))
    ref2 = _ref_head(x2.astype(jnp.float32).reshape(B2 * S2, LABEL_DIM),
                     params).reshape(B2, S2, 1)
    assert out2.shape == (B2, S2, 1)
    err2 = float(jnp.max(jnp.abs(out2 - ref2)))
    assert err2 < 1e-2, f"case2 max abs err {err2}"

    print("KERNEL_OK")
</pallas_src>

<mosaic_0001>
module attributes {stable_mosaic.version = 11 : i64} {
  func.func @_mlp_head_kernel(%arg0: i32, %arg1: memref<8x32xf32, #tpu.memory_space<vmem>>, %arg2: memref<32x256xbf16, #tpu.memory_space<vmem>>, %arg3: memref<1x256xf32, #tpu.memory_space<vmem>>, %arg4: memref<1x256xf32, #tpu.memory_space<vmem>>, %arg5: memref<1xf32, #tpu.memory_space<smem>>, %arg6: memref<8x1xf32, #tpu.memory_space<vmem>>) attributes {dimension_semantics = [#tpu.dimension_semantics<parallel>], iteration_bounds = array<i64: 2>, scalar_prefetch = 0 : i64, scratch_operands = 0 : i64, tpu.core_type = #tpu.core_type<tc>, window_params = [{transform_indices = @transform_0, window_bounds = array<i64: 8, 32>}, {pipeline_mode = #tpu.pipeline_mode<synchronous>, transform_indices = @transform_1, window_bounds = array<i64: 32, 256>}, {pipeline_mode = #tpu.pipeline_mode<synchronous>, transform_indices = @transform_2, window_bounds = array<i64: 1, 256>}, {pipeline_mode = #tpu.pipeline_mode<synchronous>, transform_indices = @transform_3, window_bounds = array<i64: 1, 256>}, {transform_indices = @transform_4, window_bounds = array<i64: 1>}, {transform_indices = @transform_5, window_bounds = array<i64: 8, 1>}]} {
    %c0 = arith.constant 0 : index
    %c0_0 = arith.constant 0 : index
    %0 = vector.load %arg1[%c0, %c0_0] : memref<8x32xf32, #tpu.memory_space<vmem>>, vector<8x32xf32>
    %1 = arith.truncf %0 : vector<8x32xf32> to vector<8x32xbf16>
    %c0_1 = arith.constant 0 : index
    %c0_2 = arith.constant 0 : index
    %2 = vector.load %arg2[%c0_1, %c0_2] : memref<32x256xbf16, #tpu.memory_space<vmem>>, vector<32x256xbf16>
    %cst = arith.constant dense<0.000000e+00> : vector<8x256xf32>
    %3 = tpu.matmul %1, %2, %cst {dimension_numbers = #tpu.dot_dimension_numbers<[1], [0], [0], [1], [0, 0, 1, 1], [], []>} : vector<8x32xbf16>, vector<32x256xbf16>, vector<8x256xf32> -> vector<8x256xf32>
    %c0_3 = arith.constant 0 : index
    %c0_4 = arith.constant 0 : index
    %4 = vector.load %arg3[%c0_3, %c0_4] : memref<1x256xf32, #tpu.memory_space<vmem>>, vector<1x256xf32>
    %5 = vector.broadcast %4 : vector<1x256xf32> to vector<8x256xf32>
    %6 = arith.addf %3, %5 : vector<8x256xf32>
    %cst_5 = arith.constant 0.000000e+00 : f32
    %7 = vector.broadcast %cst_5 : f32 to vector<8x256xf32>
    %8 = arith.maximumf %6, %7 : vector<8x256xf32>
    %c0_6 = arith.constant 0 : index
    %c0_7 = arith.constant 0 : index
    %9 = vector.load %arg4[%c0_6, %c0_7] : memref<1x256xf32, #tpu.memory_space<vmem>>, vector<1x256xf32>
    %10 = vector.broadcast %9 : vector<1x256xf32> to vector<8x256xf32>
    %11 = arith.mulf %8, %10 : vector<8x256xf32>
    %cst_8 = arith.constant dense<0.000000e+00> : vector<8xf32>
    %12 = vector.multi_reduction <add>, %11, %cst_8 [1] : vector<8x256xf32> to vector<8xf32>
    %13 = vector.shape_cast %12 : vector<8xf32> to vector<8x1xf32>
    %c0_9 = arith.constant 0 : index
    %14 = memref.load %arg5[%c0_9] : memref<1xf32, #tpu.memory_space<smem>>
    %15 = vector.broadcast %14 : f32 to vector<8x1xf32>
    %16 = arith.addf %13, %15 : vector<8x1xf32>
    %17 = arith.negf %16 : vector<8x1xf32>
    %18 = math.exp %17 : vector<8x1xf32>
    %cst_10 = arith.constant 1.000000e+00 : f32
    %19 = vector.broadcast %cst_10 : f32 to vector<8x1xf32>
    %20 = arith.addf %19, %18 : vector<8x1xf32>
    %21 = arith.divf %19, %20 : vector<8x1xf32>
    %c0_11 = arith.constant 0 : index
    %c0_12 = arith.constant 0 : index
    %22 = vector.load %arg6[%c0_11, %c0_12] : memref<8x1xf32, #tpu.memory_space<vmem>>, vector<8x1xf32>
    tpu.vector_store %arg6[%c0_11, %c0_12], %21 {strides = array<i32>} : memref<8x1xf32, #tpu.memory_space<vmem>>, vector<8x1xf32>,
    return
  }
  func.func @transform_0(%arg0: i32) -> (i32, i32) {
    %c0_i32 = arith.constant 0 : i32
    %c0_i32_0 = arith.constant 0 : i32
    return %arg0, %c0_i32 : i32, i32
  }
  func.func @transform_1(%arg0: i32) -> (i32, i32) {
    %c0_i32 = arith.constant 0 : i32
    %c0_i32_0 = arith.constant 0 : i32
    %c0_i32_1 = arith.constant 0 : i32
    return %c0_i32, %c0_i32_0 : i32, i32
  }
  func.func @transform_2(%arg0: i32) -> (i32, i32) {
    %c0_i32 = arith.constant 0 : i32
    %c0_i32_0 = arith.constant 0 : i32
    %c0_i32_1 = arith.constant 0 : i32
    return %c0_i32, %c0_i32_0 : i32, i32
  }
  func.func @transform_3(%arg0: i32) -> (i32, i32) {
    %c0_i32 = arith.constant 0 : i32
    %c0_i32_0 = arith.constant 0 : i32
    %c0_i32_1 = arith.constant 0 : i32
    return %c0_i32, %c0_i32_0 : i32, i32
  }
  func.func @transform_4(%arg0: i32) -> i32 {
    %c0_i32 = arith.constant 0 : i32
    %c0_i32_0 = arith.constant 0 : i32
    return %c0_i32 : i32
  }
  func.func @transform_5(%arg0: i32) -> (i32, i32) {
    %c0_i32 = arith.constant 0 : i32
    %c0_i32_0 = arith.constant 0 : i32
    return %arg0, %c0_i32 : i32, i32
  }
}

</mosaic_0001>

<bundles_post_ra>
// kernel: tpu_custom_call.1
= control target key start
LH: loop header
LB: loop body
LE: loop exit
PB: predicated region body
PF: predicated region fallthrough
CT: control target
= control target key end

     0   :  { %s781_s0 = inlined_call_operand.hbm [shape: f32[16,32], index: 0, kind: input, shape index: {}]   ;;  %s782_s1 = inlined_call_operand.hbm [shape: bf16[32,256], index: 1, kind: input, shape index: {}]   ;;  %s783_s2 = inlined_call_operand.vmem [shape: f32[1,256], index: 2, kind: input, shape index: {}]   ;;  %s784_s3 = inlined_call_operand.vmem [shape: f32[1,256], index: 3, kind: input, shape index: {}]   ;;  %s785_s4 = inlined_call_operand.<no memory space> [shape: f32[1], index: 4, kind: input, shape index: {}]   ;;  %s786_s5 = inlined_call_operand.vmem [shape: f32[16,1], index: 5, kind: output, shape index: {}]  }
   0x1   :  { %10 = sst [smem:[#allocation2]] %s785_s4 }
   0x2   :  { %11 = vsyncpa [#allocation4], 0 }
   0x3   :  { %13 = vsyncpa [#allocation4 + $0x1], 0 }
   0x4   :  { %14 = vsyncpa [#allocation6], 0  ;;  %s658_s20 = smov 0   ;;  %s660_s21 = smov 0  }
   0x5   :  { %s662_s22 = smov 0   ;;  %s664_s23 = smov 0  }
   0x6 LB: > { %s677_s4 = sadd.s32 4294967295, %s618_s23   ;;  %p40_p0 = scmp.ne.s32.totalorder %s610_s21, %s606_s20  ;;  %s618_s23 = sphi %s664_s23, %s801_s23   ;;  %s614_s22 = sphi %s662_s22, %s800_s22   ;;  %s610_s21 = sphi %s660_s21, %s799_s21   ;;  %s606_s20 = sphi %s658_s20, %s798_s20  }
   0x7   : > { %p787_p1 = scmp.eq.s32.totalorder %s677_s4, 0  ;;  %p446_p2 = scmp.ge.s32.totalorder %s618_s23, 1 }
   0x8   : > { %p161_p3 = scmp.lt.s32.totalorder %s618_s23, 3  ;;  %s620_s26 = smov [#allocation5]  }
   0x9   : > { %p685_p4 = por %p787_p1, %p40_p0  ;;  %s173_s27 = sshll.u32 %s620_s26, 4  ;;  %s174_s27 = int_to_ptr.vmem [resolvable:$true] %s173_s27 }
   0xa   : > { %p689_p5 = pnand %p446_p2, %p161_p3  ;;  %s702_s29 = sadd.s32 1, %s618_s23  }
   0xb   : > { %s790_s24 = scalar_select %p685_p4, 1, 0 }
   0xc   : > { %s791_s25 = scalar_select %p689_p5, 1, 0 }
   0xd   : > { %p469_p6 = pneg %p689_p5  ;;  %s27_s30 = sadd.s32 1, %s614_s22 }
   0xe   : > { %s24_s6 = ssub.s32 %s618_s23, %s702_s29  ;;  %s537_s7 = scalar_lea.vmem %s174_s27, 512 }
   0xf   : > { %p697_p7 = pnand %p469_p6, %p787_p1  ;;  %p538_p9 = scmp.ne.s32.totalorder %s174_s27, %s537_s7 }
  0x10   : > { %p545_p12 = scmp.lt.s32.totalorder %s174_s27, %s174_s27  ;;  %p546_p13 = scmp.lt.s32.totalorder %s537_s7, %s537_s7 }
  0x11   : > { %p528_p8 = pneg %p697_p7 }
  0x12   : > { %p547_p0 = por %p546_p13, %p545_p12 }
  0x13   : > { %p540_p10 = pnand %p538_p9, %p528_p8 }
  0x15   : > { %p541_p11 = pneg %p540_p10 }
  0x17   : > { %p548_p2 = pnand %p547_p0, %p541_p11 }
  0x19   : > { %551 = shalt.err (!%p548_p2)
}
  0x1a   : > { %s621_s8 = smov 128   ;;  %s622_s9 = smov 8  }
  0x1b   : > { %472 = dma.hbm_to_vmem [thread:$0]  (!%p697_p7), %s782_s1, 512, %s174_s27, [#allocation6], %s621_s8, %s621_s8, %s622_s9  }
  0x1c   : > { %p25_p3 = scmp.eq.s32.totalorder %s24_s6, 0  ;;  %p34_p6 = scmp.ne.s32.totalorder %s614_s22, %s610_s21 }
  0x1d   : > { %p35_p8 = scmp.eq.s32.totalorder %s618_s23, 0  ;;  %p478_p9 = scmp.lt.s32.totalorder %s618_s23, 2 }
  0x1e   : > { %s719_s12 = scalar_select %p25_p3, %s614_s22, %s27_s30  }
  0x1f   : > { %p36_p10 = por %p35_p8, %p34_p6  ;;  %s196_s13 = sand.u32 1, %s614_s22  }
  0x20   : > { %s449_s14 = sshll.u32 %s196_s13, 3  ;;  %s450_s15 = sshll.u32 %s618_s23, 7 }
  0x21   : > { %s726_s18 = scalar_lea.hbm %s781_s0, %s450_s15  ;;  %s200_s19 = scalar_lea.vmem [#allocation3], %s449_s14 }
  0x22   : > { %s207_s20 = sshll.u32 %s200_s19, 4  ;;  %p728_p7 = pnand %p478_p9, %p36_p10  ;;  %s208_s20 = int_to_ptr.vmem [resolvable:$true] %s207_s20 }
  0x23   : > { %s197_s27 = scalar_lea.sflag [#allocation4], %s196_s13  ;;  %s552_s28 = scalar_lea.hbm %s726_s18, 128 }
  0x24   : > { %p553_p11 = scmp.ne.s32.totalorder %s726_s18, %s552_s28  ;;  %p554_p12 = pneg %p728_p7 }
  0x25   : > { %s557_s6 = scalar_lea.hbm %s781_s0, 256  ;;  %p558_p2 = scmp.lt.s32.totalorder %s726_s18, %s781_s0 }
  0x26   : > { %p555_p13 = pnand %p554_p12, %p553_p11  ;;  %p559_p3 = scmp.lt.s32.totalorder %s557_s6, %s552_s28 }
  0x28   : > { %p556_p0 = pneg %p555_p13  ;;  %p560_p6 = por %p559_p3, %p558_p2 }
  0x2a   : > { %p561_p8 = pnand %p560_p6, %p556_p0 }
  0x2c   : > { %564 = shalt.err (!%p561_p8)
}
  0x2d   : > { %s565_s9 = scalar_lea.vmem %s208_s20, 128  ;;  %s623_s10 = smov [#allocation3]  }
  0x2e   : > { %p566_p9 = scmp.ne.s32.totalorder %s208_s20, %s565_s9  ;;  %s570_s11 = sshll.u32 %s623_s10, 4  ;;  %s571_s11 = int_to_ptr.vmem [resolvable:$false] %s570_s11 }
  0x2f   : > { %s572_s13 = scalar_lea.vmem %s571_s11, 256  ;;  %p573_p11 = scmp.lt.s32.totalorder %s208_s20, %s571_s11 }
  0x30   : > { %p568_p10 = pnand %p566_p9, %p554_p12  ;;  %p574_p13 = scmp.lt.s32.totalorder %s572_s13, %s565_s9 }
  0x32   : > { %p569_p1 = pneg %p568_p10  ;;  %p575_p4 = por %p574_p13, %p573_p11 }
  0x34   : > { %p576_p5 = pnand %p575_p4, %p569_p1 }
  0x36   : > { %579 = shalt.err (!%p576_p5)
}
  0x37   : > { %476 = dma.hbm_to_vmem [thread:$0]  (!%p728_p7), %s726_s18, 128, %s208_s20, %s197_s27  }
  0x38   : > { %p794_p0 = scmp.ne.s32.totalorder %s791_s25, 0 }
  0x39   : > { %s218_s14 = sand.u32 (!%p794_p0), 1, %s610_s21   ;;  %p795_p12 = scmp.ne.s32.totalorder (!%p794_p0), %s790_s24, 0 }
  0x3a   : > { %216 = sbr.rel (%p794_p0) target bundleno = 452 (0x1c4), region = 40  ;;  %s452_s15 = sshll.u32 (!%p794_p0), %s218_s14, 3 }
  0x3b   : > { %s219_s16 = scalar_lea.sflag (!%p794_p0), [#allocation4], %s218_s14  ;;  %s222_s17 = scalar_lea.vmem (!%p794_p0), [#allocation3], %s452_s15 }
  0x3f   : > { %597 = dma.done.wait (%p795_p12), %s219_s16, 128  }
  0x40   : > { %599 = vsyncadd (%p795_p12), %s219_s16, 4294967168  ;;  %p796_p1 = scmp.eq.s32.totalorder %s677_s4, 0 }
  0x42   : > { %601 = dma.done.wait (%p796_p1), [#allocation6], 512   ;;  %p797_p4 = pmov %p796_p1 }
  0x43   : > { %v624_v0 = vmov 0   ;;  %v516_v1 = vld [vmem:[#allocation5 + $0x14] ss:$8 sps:$4 sm:$0xff]   ;;  %v518_v2 = vld [vmem:[#allocation5 + $0x10] ss:$8 sps:$4 sm:$0xff]   ;;  %vm295_vm0 = vcmask 261120   ;;  %v265_v7 = vlaneseq }
  0x44   : > { %603 = vsyncadd (%p797_p4), [#allocation6], 4294966784  ;;  %331 = vmatprep.mubr.bf16.mxu0 %v624_v0  ;;  %311 = vmatprep.subr.bf16.mxu0 %v516_v1  ;;  %v519_v3 = vld [vmem:[#allocation5 + $0x4] ss:$8 sps:$4 sm:$0xff]   ;;  %v521_v4 = vld [vmem:[#allocation5] ss:$8 sps:$4 sm:$0xff]  }
  0x45   : > { %312 = vmatpush1.bf16.msra.mxu0 %v518_v2  ;;  %v257_v5 = vld [vmem:[%s222_s17] sm:$0xff]  ;;  %v266_v8 = vshrl.u32 %v265_v7, 7  ;;  %s359_s20 = sld [smem:[#allocation2]]  ;;  %p252_p5 = scmp.lt.s32.totalorder %s677_s4, 1  ;;  %vm368_vm1 = vcmask 7168  }
  0x46   : > { %313 = vmatprep.subr.bf16.mxu0 %v519_v3  ;;  %v258_v6 = vpack.c.bf16 %v257_v5, %v257_v5  ;;  %v263_v10 = vld [vmem:[%s783_s2] sm:$0x3] }
  0x47   : > { %v267_v9 = vsub.s32 0, %v266_v8  ;;  %v271_v11 = vsub.s32 1, %v266_v8  ;;  %v342_v15 = vld [vmem:[%s784_s3] sm:$0x3]  ;;  %s803_s4 = smov (!%p252_p5, %s677_s4), 1 }
  0x48   : > { %s454_s26 = sshll.u32 %s803_s4, 3 }
  0x49   : > { %314 = vmatpush1.bf16.msra.mxu0 %v521_v4  ;;  %v268_v12 = vrot.slane %v263_v10, %v267_v9  ;;  %v272_v13 = vrot.slane %v263_v10, %v271_v11  ;;  %v347_v20 = vrot.slane %v342_v15, %v267_v9  ;;  %v351_v21 = vrot.slane %v342_v15, %v271_v11  ;;  %s255_s23 = scalar_lea.vmem %s786_s5, %s454_s26 }
  0x4b   : > { %v360_v28 = vstv %s359_s20 }
  0x4c   : > { %459 = vmatmul.mubr.msk.bf16.vlgmr.msra.gmra.mxu0 %vm295_vm0, %v258_v6 }
 0x10c   : > { %v333_v14 = vpop.f32.mrf.mxu0 }
 0x10d   : > { %v334_v16 = vadd.f32 %v333_v14, %v268_v12 }
 0x10e   : > { %v335_v17 = vpop.f32.mrf.mxu0 }
 0x10f   : > { %v340_v18 = vmax.f32 %v334_v16, 0.0  ;;  %v336_v19 = vadd.f32 %v335_v17, %v272_v13 }
 0x110   : > { %v337_v22 = vpop.f32.mrf.mxu0 }
 0x111   : > { %v341_v23 = vmax.f32 %v336_v19, 0.0  ;;  %v354_v25 = vmul.f32 %v347_v20, %v340_v18 }
 0x112   : > { %v338_v24 = vpop.f32.mrf.mxu0 }
 0x113   : > { %v355_v26 = vmul.f32 %v351_v21, %v341_v23 }
 0x115   : > { %v356_v27 = vadd.f32 %v355_v26, %v354_v25 }
 0x117   : > { %357 = vadd.xlane.f32.xlu0 %v356_v27 }
 0x1a0   : > { %v358_v29 = vpop.xlane.xlu0 %357 }
 0x1a1   : > { %v361_v30 = vadd.f32 %v360_v28, %v358_v29 }
 0x1a3   : > { %v460_v31 = vmul.f32 -1.442695, %v361_v30 }
 0x1a5   : > { %522 = vpow2.f32 %v460_v31 }
 0x1b2   : > { %v523_v32 = vpop.eup %522 }
 0x1b3   : > { %v365_v33 = vadd.f32 1.0, %v523_v32 }
 0x1b5   : > { %524 = vrcp.f32 %v365_v33 }
 0x1c2   : > { %v525_v34 = vpop.eup %524 }
 0x1c3   : > { %369 = vst.msk [vmem:[%s255_s23] sm:$0xff] %vm368_vm1, %v525_v34 }
 0x1c4 PF: > { %p17_p7 = scmp.ge.s32.totalorder %s702_s29, 4   ;;  %s798_s20 = smov %s610_s21 }
 0x1c5   : > { %s799_s21 = smov %s614_s22  ;;  %s800_s22 = smov %s719_s12 }
 0x1c6   : > { %s801_s23 = smov %s702_s29  ;;  %19 = sbr.rel (!%p17_p7) target bundleno = 6 (0x6), region = 84 }
 0x1cb   :  { %389 = vsyncpa [#allocation4], 1 }
 0x1cc   :  { %391 = vsyncpa [#allocation4 + $0x1], 1 }
 0x1cd   :  { %392 = vsyncpa [#allocation6], 1 }

</bundles_post_ra>
